<compile_context>
chip_gen: v7x
topology: tpu7x:2x2x1
jax: 0.10.0
libtpu: 0.0.40
codegen_flags: <defaults>
</compile_context>

<pallas_src>
import jax
import jax.numpy as jnp
from jax.experimental import pallas as pl
from jax.experimental.pallas import tpu as pltpu

H1 = 250            # hidden 1 (logical)
H2 = 100            # hidden 2 (logical)
H1_PAD = 256        # lane-padded
H2_PAD = 128        # lane-padded
LANE = 128
SUBLANE = 16        # bf16 packing: keep batch tiles sublane-dense for bf16 tiles
MAX_TILE_B = 1024   # fits comfortably in scoped VMEM on v5e/v6e/v7x with f32 x tiles


def _round_up(n, m):
    return (n + m - 1) // m * m


def _cdiv(a, b):
    return (a + b - 1) // b


def _choose_tiling(b):
    """Pick (tile_b, b_pad) minimizing padding; force >=2 grid steps when the
    batch is large enough so v7x's two TensorCores both get tiles."""
    n_tiles = max(_cdiv(b, MAX_TILE_B), 2 if b >= 2 * SUBLANE else 1)
    tile_b = _round_up(_cdiv(b, n_tiles), SUBLANE)
    b_pad = tile_b * n_tiles
    return tile_b, b_pad


def mlp_kernel(x_ref, w1_ref, b1_ref, w2_ref, b2_ref, w3_ref, b3_ref,
               y_ref, h2_ref):
    # x: (TILE_B, Din_pad) f32 -> cast to bf16 in-register (VALU has slack,
    # MXU/DMA are the binding units); weights: (in_pad, out_pad) bf16;
    # biases: (1, out_pad) f32.
    x = x_ref[...].astype(jnp.bfloat16)

    # layer 1: Linear(input_dim, 250) + ReLU  (padded cols of w1/b1 are zero)
    h1 = jnp.dot(x, w1_ref[...], preferred_element_type=jnp.float32) + b1_ref[...]
    h1 = jnp.maximum(h1, 0.0)

    # layer 2: Linear(250, 100) + ReLU
    h2 = jnp.dot(h1.astype(jnp.bfloat16), w2_ref[...],
                 preferred_element_type=jnp.float32) + b2_ref[...]
    h2 = jnp.maximum(h2, 0.0)
    h2_bf = h2.astype(jnp.bfloat16)
    h2_ref[...] = h2_bf                      # bf16 writeback (half the bytes)

    # layer 3: Linear(100, output_dim), no activation
    y = jnp.dot(h2_bf, w3_ref[...], preferred_element_type=jnp.float32) + b3_ref[...]
    y_ref[...] = y.astype(jnp.bfloat16)      # bf16 writeback


def prepare_params(params):
    """One-time conversion of PyTorch-style (out, in) f32 params into kernel layout:
    transposed to (in, out), zero-padded to lane multiples of 128, weights bf16,
    biases f32 rows (1, out_pad). Zero padding keeps the math exact for the
    logical (unpadded) slice."""
    w1, b1, w2, b2, w3, b3 = params
    din = w1.shape[1]
    out_dim = w3.shape[0]
    din_p = _round_up(din, LANE)
    out_p = _round_up(out_dim, LANE)

    def pad_w(w_t, in_p, o_p):  # w_t: (in, out)
        return jnp.pad(w_t, ((0, in_p - w_t.shape[0]), (0, o_p - w_t.shape[1])))

    w1t = pad_w(w1.T, din_p, H1_PAD).astype(jnp.bfloat16)
    w2t = pad_w(w2.T, H1_PAD, H2_PAD).astype(jnp.bfloat16)
    w3t = pad_w(w3.T, H2_PAD, out_p).astype(jnp.bfloat16)
    b1r = jnp.pad(b1, (0, H1_PAD - b1.shape[0])).reshape(1, -1).astype(jnp.float32)
    b2r = jnp.pad(b2, (0, H2_PAD - b2.shape[0])).reshape(1, -1).astype(jnp.float32)
    b3r = jnp.pad(b3, (0, out_p - b3.shape[0])).reshape(1, -1).astype(jnp.float32)
    return (w1t, b1r, w2t, b2r, w3t, b3r), din, out_dim


def mlp_forward(x, prepared, din, out_dim):
    """x: any shape (B, ...). Returns (y_pred, h_2) like the PyTorch module (f32)."""
    b = x.shape[0]
    x2d = x.reshape(b, -1)                       # glue: flatten like x.view(B, -1)
    assert x2d.shape[1] == din
    din_p = _round_up(din, LANE)
    out_p = _round_up(out_dim, LANE)

    tile_b, b_pad = _choose_tiling(b)

    # x stays f32 (cast happens in-kernel); only zero-pad batch / feature dims
    # when actually needed.
    if b_pad != b or din_p != din:
        x_pad = jnp.pad(x2d, ((0, b_pad - b), (0, din_p - din)))
    else:
        x_pad = x2d
    x_pad = x_pad.astype(jnp.float32)

    w1t, b1r, w2t, b2r, w3t, b3r = prepared

    def resident(arr):
        # full-array block, same block every grid step -> stays VMEM-resident
        return pl.BlockSpec(arr.shape, lambda i: (0, 0))

    y_pad, h2_pad = pl.pallas_call(
        mlp_kernel,
        out_shape=(
            jax.ShapeDtypeStruct((b_pad, out_p), jnp.bfloat16),
            jax.ShapeDtypeStruct((b_pad, H2_PAD), jnp.bfloat16),
        ),
        grid=(b_pad // tile_b,),
        in_specs=[
            pl.BlockSpec((tile_b, din_p), lambda i: (i, 0)),   # x tiled over batch
            resident(w1t), resident(b1r),
            resident(w2t), resident(b2r),
            resident(w3t), resident(b3r),
        ],
        out_specs=(
            pl.BlockSpec((tile_b, out_p), lambda i: (i, 0)),
            pl.BlockSpec((tile_b, H2_PAD), lambda i: (i, 0)),
        ),
        compiler_params=pltpu.CompilerParams(
            dimension_semantics=("parallel",),
            vmem_limit_bytes=32 * 1024 * 1024,
        ),
    )(x_pad, w1t, b1r, w2t, b2r, w3t, b3r)

    # Slice off padding and restore f32 outputs (tiny arrays).
    y_pred = y_pad[:b, :out_dim].astype(jnp.float32)
    h_2 = h2_pad[:b, :H2].astype(jnp.float32)
    return y_pred, h_2


def init_params(key, input_dim, output_dim):
    """Deterministic PyTorch-Linear-style init (uniform +/- 1/sqrt(fan_in)),
    stored PyTorch-style as (out, in) weights + (out,) biases."""
    dims = [(250, input_dim), (100, 250), (output_dim, 100)]
    params = []
    for i, (fan_out, fan_in) in enumerate(dims):
        kw, kb = jax.random.split(jax.random.fold_in(key, i))
        bound = 1.0 / jnp.sqrt(fan_in)
        w = jax.random.uniform(kw, (fan_out, fan_in), jnp.float32, -bound, bound)
        bb = jax.random.uniform(kb, (fan_out,), jnp.float32, -bound, bound)
        params += [w, bb]
    return tuple(params)


if __name__ == "__main__":
    key = jax.random.PRNGKey(0)
    # Example input: (2, 4, 16, 16) -> flattened input_dim 1024.
    x = jax.random.normal(jax.random.fold_in(key, 100), (2, 4, 16, 16), jnp.float32)
    input_dim = 4 * 16 * 16
    output_dim = 10

    params = init_params(key, input_dim, output_dim)
    prepared, din, out_dim = prepare_params(params)   # one-time layout prep

    y_pred, h_2 = mlp_forward(x, prepared, din, out_dim)
    jax.block_until_ready((y_pred, h_2))

    # Reference in plain f32 JAX (same math as the PyTorch forward). The kernel
    # uses bf16 MXU operands (f32 accumulation) and bf16 output writeback, so
    # tolerances are loosened accordingly.
    w1, b1, w2, b2, w3, b3 = params
    xf = x.reshape(x.shape[0], -1)
    h1_ref = jnp.maximum(xf @ w1.T + b1, 0.0)
    h2_ref = jnp.maximum(h1_ref @ w2.T + b2, 0.0)
    y_ref = h2_ref @ w3.T + b3
    assert y_pred.shape == (2, output_dim) and h_2.shape == (2, H2)
    assert y_pred.dtype == jnp.float32 and h_2.dtype == jnp.float32
    assert jnp.allclose(y_pred, y_ref, atol=5e-2, rtol=5e-2)
    assert jnp.allclose(h_2, h2_ref, atol=5e-2, rtol=5e-2)

    print("KERNEL_OK")
</pallas_src>

<mosaic_0001>
module attributes {stable_mosaic.version = 11 : i64} {
  func.func @mlp_kernel(%arg0: i32, %arg1: memref<16x1024xf32, #tpu.memory_space<vmem>>, %arg2: memref<1024x256xbf16, #tpu.memory_space<vmem>>, %arg3: memref<1x256xf32, #tpu.memory_space<vmem>>, %arg4: memref<256x128xbf16, #tpu.memory_space<vmem>>, %arg5: memref<1x128xf32, #tpu.memory_space<vmem>>, %arg6: memref<128x128xbf16, #tpu.memory_space<vmem>>, %arg7: memref<1x128xf32, #tpu.memory_space<vmem>>, %arg8: memref<16x128xbf16, #tpu.memory_space<vmem>>, %arg9: memref<16x128xbf16, #tpu.memory_space<vmem>>) attributes {dimension_semantics = [#tpu.dimension_semantics<parallel>], iteration_bounds = array<i64: 1>, scalar_prefetch = 0 : i64, scratch_operands = 0 : i64, tpu.core_type = #tpu.core_type<tc>, window_params = [{transform_indices = @transform_0, window_bounds = array<i64: 16, 1024>}, {pipeline_mode = #tpu.pipeline_mode<synchronous>, transform_indices = @transform_1, window_bounds = array<i64: 1024, 256>}, {pipeline_mode = #tpu.pipeline_mode<synchronous>, transform_indices = @transform_2, window_bounds = array<i64: 1, 256>}, {pipeline_mode = #tpu.pipeline_mode<synchronous>, transform_indices = @transform_3, window_bounds = array<i64: 256, 128>}, {pipeline_mode = #tpu.pipeline_mode<synchronous>, transform_indices = @transform_4, window_bounds = array<i64: 1, 128>}, {pipeline_mode = #tpu.pipeline_mode<synchronous>, transform_indices = @transform_5, window_bounds = array<i64: 128, 128>}, {pipeline_mode = #tpu.pipeline_mode<synchronous>, transform_indices = @transform_6, window_bounds = array<i64: 1, 128>}, {transform_indices = @transform_7, window_bounds = array<i64: 16, 128>}, {transform_indices = @transform_8, window_bounds = array<i64: 16, 128>}]} {
    %c0 = arith.constant 0 : index
    %c0_0 = arith.constant 0 : index
    %0 = vector.load %arg1[%c0, %c0_0] : memref<16x1024xf32, #tpu.memory_space<vmem>>, vector<16x1024xf32>
    %1 = arith.truncf %0 : vector<16x1024xf32> to vector<16x1024xbf16>
    %c0_1 = arith.constant 0 : index
    %c0_2 = arith.constant 0 : index
    %2 = vector.load %arg2[%c0_1, %c0_2] : memref<1024x256xbf16, #tpu.memory_space<vmem>>, vector<1024x256xbf16>
    %cst = arith.constant dense<0.000000e+00> : vector<16x256xf32>
    %3 = tpu.matmul %1, %2, %cst {dimension_numbers = #tpu.dot_dimension_numbers<[1], [0], [0], [1], [0, 0, 1, 1], [], []>} : vector<16x1024xbf16>, vector<1024x256xbf16>, vector<16x256xf32> -> vector<16x256xf32>
    %c0_3 = arith.constant 0 : index
    %c0_4 = arith.constant 0 : index
    %4 = vector.load %arg3[%c0_3, %c0_4] : memref<1x256xf32, #tpu.memory_space<vmem>>, vector<1x256xf32>
    %5 = vector.broadcast %4 : vector<1x256xf32> to vector<16x256xf32>
    %6 = arith.addf %3, %5 : vector<16x256xf32>
    %cst_5 = arith.constant 0.000000e+00 : f32
    %7 = vector.broadcast %cst_5 : f32 to vector<16x256xf32>
    %8 = arith.maximumf %6, %7 : vector<16x256xf32>
    %9 = arith.truncf %8 : vector<16x256xf32> to vector<16x256xbf16>
    %c0_6 = arith.constant 0 : index
    %c0_7 = arith.constant 0 : index
    %10 = vector.load %arg4[%c0_6, %c0_7] : memref<256x128xbf16, #tpu.memory_space<vmem>>, vector<256x128xbf16>
    %cst_8 = arith.constant dense<0.000000e+00> : vector<16x128xf32>
    %11 = tpu.matmul %9, %10, %cst_8 {dimension_numbers = #tpu.dot_dimension_numbers<[1], [0], [0], [1], [0, 0, 1, 1], [], []>} : vector<16x256xbf16>, vector<256x128xbf16>, vector<16x128xf32> -> vector<16x128xf32>
    %c0_9 = arith.constant 0 : index
    %c0_10 = arith.constant 0 : index
    %12 = vector.load %arg5[%c0_9, %c0_10] : memref<1x128xf32, #tpu.memory_space<vmem>>, vector<1x128xf32>
    %13 = vector.broadcast %12 : vector<1x128xf32> to vector<16x128xf32>
    %14 = arith.addf %11, %13 : vector<16x128xf32>
    %cst_11 = arith.constant 0.000000e+00 : f32
    %15 = vector.broadcast %cst_11 : f32 to vector<16x128xf32>
    %16 = arith.maximumf %14, %15 : vector<16x128xf32>
    %17 = arith.truncf %16 : vector<16x128xf32> to vector<16x128xbf16>
    %c0_12 = arith.constant 0 : index
    %c0_13 = arith.constant 0 : index
    %18 = vector.load %arg9[%c0_12, %c0_13] : memref<16x128xbf16, #tpu.memory_space<vmem>>, vector<16x128xbf16>
    tpu.vector_store %arg9[%c0_12, %c0_13], %17 {strides = array<i32>} : memref<16x128xbf16, #tpu.memory_space<vmem>>, vector<16x128xbf16>,
    %c0_14 = arith.constant 0 : index
    %c0_15 = arith.constant 0 : index
    %19 = vector.load %arg6[%c0_14, %c0_15] : memref<128x128xbf16, #tpu.memory_space<vmem>>, vector<128x128xbf16>
    %cst_16 = arith.constant dense<0.000000e+00> : vector<16x128xf32>
    %20 = tpu.matmul %17, %19, %cst_16 {dimension_numbers = #tpu.dot_dimension_numbers<[1], [0], [0], [1], [0, 0, 1, 1], [], []>} : vector<16x128xbf16>, vector<128x128xbf16>, vector<16x128xf32> -> vector<16x128xf32>
    %c0_17 = arith.constant 0 : index
    %c0_18 = arith.constant 0 : index
    %21 = vector.load %arg7[%c0_17, %c0_18] : memref<1x128xf32, #tpu.memory_space<vmem>>, vector<1x128xf32>
    %22 = vector.broadcast %21 : vector<1x128xf32> to vector<16x128xf32>
    %23 = arith.addf %20, %22 : vector<16x128xf32>
    %24 = arith.truncf %23 : vector<16x128xf32> to vector<16x128xbf16>
    %c0_19 = arith.constant 0 : index
    %c0_20 = arith.constant 0 : index
    %25 = vector.load %arg8[%c0_19, %c0_20] : memref<16x128xbf16, #tpu.memory_space<vmem>>, vector<16x128xbf16>
    tpu.vector_store %arg8[%c0_19, %c0_20], %24 {strides = array<i32>} : memref<16x128xbf16, #tpu.memory_space<vmem>>, vector<16x128xbf16>,
    return
  }
  func.func @transform_0(%arg0: i32) -> (i32, i32) {
    %c0_i32 = arith.constant 0 : i32
    %c0_i32_0 = arith.constant 0 : i32
    return %arg0, %c0_i32 : i32, i32
  }
  func.func @transform_1(%arg0: i32) -> (i32, i32) {
    %c0_i32 = arith.constant 0 : i32
    %c0_i32_0 = arith.constant 0 : i32
    %c0_i32_1 = arith.constant 0 : i32
    return %c0_i32, %c0_i32_0 : i32, i32
  }
  func.func @transform_2(%arg0: i32) -> (i32, i32) {
    %c0_i32 = arith.constant 0 : i32
    %c0_i32_0 = arith.constant 0 : i32
    %c0_i32_1 = arith.constant 0 : i32
    return %c0_i32, %c0_i32_0 : i32, i32
  }
  func.func @transform_3(%arg0: i32) -> (i32, i32) {
    %c0_i32 = arith.constant 0 : i32
    %c0_i32_0 = arith.constant 0 : i32
    %c0_i32_1 = arith.constant 0 : i32
    return %c0_i32, %c0_i32_0 : i32, i32
  }
  func.func @transform_4(%arg0: i32) -> (i32, i32) {
    %c0_i32 = arith.constant 0 : i32
    %c0_i32_0 = arith.constant 0 : i32
    %c0_i32_1 = arith.constant 0 : i32
    return %c0_i32, %c0_i32_0 : i32, i32
  }
  func.func @transform_5(%arg0: i32) -> (i32, i32) {
    %c0_i32 = arith.constant 0 : i32
    %c0_i32_0 = arith.constant 0 : i32
    %c0_i32_1 = arith.constant 0 : i32
    return %c0_i32, %c0_i32_0 : i32, i32
  }
  func.func @transform_6(%arg0: i32) -> (i32, i32) {
    %c0_i32 = arith.constant 0 : i32
    %c0_i32_0 = arith.constant 0 : i32
    %c0_i32_1 = arith.constant 0 : i32
    return %c0_i32, %c0_i32_0 : i32, i32
  }
  func.func @transform_7(%arg0: i32) -> (i32, i32) {
    %c0_i32 = arith.constant 0 : i32
    %c0_i32_0 = arith.constant 0 : i32
    return %arg0, %c0_i32 : i32, i32
  }
  func.func @transform_8(%arg0: i32) -> (i32, i32) {
    %c0_i32 = arith.constant 0 : i32
    %c0_i32_0 = arith.constant 0 : i32
    return %arg0, %c0_i32 : i32, i32
  }
}

</mosaic_0001>

<bundles_post_ra>
// kernel: tpu_custom_call.1
= control target key start
LH: loop header
LB: loop body
LE: loop exit
PB: predicated region body
PF: predicated region fallthrough
CT: control target
= control target key end

     0   :  { %14 = vsyncpa [#allocation3], 0  ;;  %s2175_s0 = inlined_call_operand.hbm [shape: f32[16,1024], index: 0, kind: input, shape index: {}]   ;;  %s2176_s1 = inlined_call_operand.hbm [shape: bf16[1024,256], index: 1, kind: input, shape index: {}]   ;;  %s2177_s2 = inlined_call_operand.vmem [shape: f32[1,256], index: 2, kind: input, shape index: {}]   ;;  %s2178_s3 = inlined_call_operand.hbm [shape: bf16[256,128], index: 3, kind: input, shape index: {}]   ;;  %s2179_s4 = inlined_call_operand.vmem [shape: f32[1,128], index: 4, kind: input, shape index: {}]   ;;  %s2180_s5 = inlined_call_operand.hbm [shape: bf16[128,128], index: 5, kind: input, shape index: {}]   ;;  %s2181_s6 = inlined_call_operand.vmem [shape: f32[1,128], index: 6, kind: input, shape index: {}]   ;;  %s2182_s7 = inlined_call_operand.hbm [shape: bf16[16,128], index: 7, kind: output, shape index: {0}]   ;;  %s2183_s8 = inlined_call_operand.hbm [shape: bf16[16,128], index: 8, kind: output, shape index: {1}]  }
   0x1   :  { %15 = vsyncpa [#allocation6], 0 }
   0x2   :  { %16 = vsyncpa [#allocation9], 0 }
   0x3   :  { %17 = vsyncpa [#allocation4], 0 }
   0x4   :  { %18 = vsyncpa [#allocation12], 0  ;;  %s2023_s27 = smov [#allocation5]   ;;  %s1881_s9 = scalar_lea.hbm %s2176_s1, 16384 }
   0x5   :  { %s36_s28 = sshll.u32 %s2023_s27, 4  ;;  %p1882_p0 = scmp.ne.s32.totalorder %s2176_s1, %s1881_s9  ;;  %s37_s28 = int_to_ptr.vmem [resolvable:$true] %s36_s28 }
   0x6   :  { %p1885_p1 = scmp.lt.u32.totalorder %s1881_s9, %s2176_s1 }
   0x8   :  { %p1887_p2 = pnand %p1885_p1, %p1882_p0 }
   0xa   :  { %1890 = shalt.err (!%p1887_p2)
}
   0xb   :  { %s1891_s14 = scalar_lea.vmem %s37_s28, 16384  ;;  %p1896_p4 = scmp.lt.s32.totalorder %s37_s28, %s37_s28 }
   0xc   :  { %p1892_p3 = scmp.ne.s32.totalorder %s37_s28, %s1891_s14  ;;  %p1897_p5 = scmp.lt.s32.totalorder %s1891_s14, %s1891_s14 }
   0xe   :  { %p1898_p6 = por %p1897_p5, %p1896_p4 }
  0x10   :  { %p1899_p7 = pnand %p1898_p6, %p1892_p3 }
  0x12   :  { %1902 = shalt.err (!%p1899_p7)
}
  0x13   :  { %s2024_s15 = smov 128   ;;  %s2025_s16 = smov 8  }
  0x14   :  { %42 = dma.hbm_to_vmem [thread:$0]  %s2176_s1, 16384, %s37_s28, [#allocation6], %s2024_s15, %s2024_s15, %s2025_s16  }
  0x15   :  { %s2026_s19 = smov [#allocation2]   ;;  %s1903_s23 = scalar_lea.hbm %s2175_s0, 2048 }
  0x16   :  { %s24_s20 = sshll.u32 %s2026_s19, 4  ;;  %p1904_p8 = scmp.ne.s32.totalorder %s2175_s0, %s1903_s23  ;;  %s25_s20 = int_to_ptr.vmem [resolvable:$true] %s24_s20 }
  0x17   :  { %p1907_p9 = scmp.lt.u32.totalorder %s1903_s23, %s2175_s0 }
  0x19   :  { %p1909_p10 = pnand %p1907_p9, %p1904_p8 }
  0x1b   :  { %1912 = shalt.err (!%p1909_p10)
}
  0x1c   :  { %s1913_s29 = scalar_lea.vmem %s25_s20, 2048  ;;  %p1918_p12 = scmp.lt.s32.totalorder %s25_s20, %s25_s20 }
  0x1d   :  { %p1914_p11 = scmp.ne.s32.totalorder %s25_s20, %s1913_s29  ;;  %p1919_p13 = scmp.lt.s32.totalorder %s1913_s29, %s1913_s29 }
  0x1f   :  { %p1920_p0 = por %p1919_p13, %p1918_p12 }
  0x21   :  { %p1921_p1 = pnand %p1920_p0, %p1914_p11 }
  0x23   :  { %1924 = shalt.err (!%p1921_p1)
}
  0x24   :  { %s2027_s1 = smov 1024   ;;  %s2028_s28 = smov 64  }
  0x25   :  { %30 = dma.hbm_to_vmem [thread:$0]  %s2175_s0, 2048, %s25_s20, [#allocation3], %s2027_s1, %s2027_s1, %s2028_s28  }
  0x26   :  { %s2029_s10 = smov [#allocation7]   ;;  %s2030_s12 = smov [#allocation8]  }
  0x27   :  { %s50_s11 = sshll.u32 %s2029_s10, 4  ;;  %s64_s13 = sshll.u32 %s2030_s12, 4  ;;  %s51_s11 = int_to_ptr.vmem [resolvable:$true] %s50_s11  ;;  %s65_s13 = int_to_ptr.vmem [resolvable:$true] %s64_s13 }
  0x28   :  { %s1925_s16 = scalar_lea.hbm %s2178_s3, 2048 }
  0x29   :  { %p1926_p2 = scmp.ne.s32.totalorder %s2178_s3, %s1925_s16  ;;  %p1929_p3 = scmp.lt.u32.totalorder %s1925_s16, %s2178_s3 }
  0x2b   :  { %p1931_p4 = pnand %p1929_p3, %p1926_p2 }
  0x2d   :  { %1934 = shalt.err (!%p1931_p4)
}
  0x2e   :  { %s1935_s0 = scalar_lea.vmem %s51_s11, 2048  ;;  %p1940_p6 = scmp.lt.s32.totalorder %s51_s11, %s51_s11 }
  0x2f   :  { %p1936_p5 = scmp.ne.s32.totalorder %s51_s11, %s1935_s0  ;;  %p1941_p7 = scmp.lt.s32.totalorder %s1935_s0, %s1935_s0 }
  0x31   :  { %p1942_p8 = por %p1941_p7, %p1940_p6 }
  0x33   :  { %p1943_p9 = pnand %p1942_p8, %p1936_p5 }
  0x35   :  { %1946 = shalt.err (!%p1943_p9)
}
  0x36   :  { %s2031_s20 = smov 4   ;;  %s1947_s26 = scalar_lea.hbm %s2180_s5, 1024 }
  0x37   :  { %56 = dma.hbm_to_vmem [thread:$0]  %s2178_s3, 2048, %s51_s11, [#allocation6], %s2028_s28, %s2028_s28, %s2031_s20  }
  0x38   :  { %p1948_p10 = scmp.ne.s32.totalorder %s2180_s5, %s1947_s26  ;;  %p1951_p11 = scmp.lt.u32.totalorder %s1947_s26, %s2180_s5 }
  0x3a   :  { %p1953_p12 = pnand %p1951_p11, %p1948_p10 }
  0x3c   :  { %1956 = shalt.err (!%p1953_p12)
}
  0x3d   :  { %s1957_s9 = scalar_lea.vmem %s65_s13, 1024  ;;  %p1962_p0 = scmp.lt.s32.totalorder %s65_s13, %s65_s13 }
  0x3e   :  { %p1958_p13 = scmp.ne.s32.totalorder %s65_s13, %s1957_s9  ;;  %p1963_p1 = scmp.lt.s32.totalorder %s1957_s9, %s1957_s9 }
  0x40   :  { %p1964_p2 = por %p1963_p1, %p1962_p0 }
  0x42   :  { %p1965_p3 = pnand %p1964_p2, %p1958_p13 }
  0x44   :  { %1968 = shalt.err (!%p1965_p3)
}
  0x45   :  { %70 = dma.hbm_to_vmem [thread:$0]  %s2180_s5, 1024, %s65_s13, [#allocation9], %s2028_s28, %s2028_s28, %s2031_s20  }
  0x46   :  { %2013 = dma.done.wait [#allocation3], 2048  }
  0x47   :  { %2014 = vsyncadd [#allocation3], 4294965248 }
  0x48   :  { %2015 = dma.done.wait [#allocation6], 18432  }
  0x49   :  { %2016 = vsyncadd [#allocation6], 4294948864 }
  0x4a   :  { %2017 = dma.done.wait [#allocation9], 1024  }
  0x4b   :  { %2018 = vsyncadd [#allocation9], 4294966272  ;;  %v1665_v0 = vld [vmem:[#allocation5 + $0x104] ss:$8 sps:$4 sm:$0xff]   ;;  %v1667_v1 = vld [vmem:[#allocation5 + $0x100] ss:$8 sps:$4 sm:$0xff]  }
  0x4c   :  { %933 = vmatprep.subr.bf16.mxu0 %v1665_v0  ;;  %v1668_v2 = vld [vmem:[#allocation5 + $0x114] ss:$8 sps:$4 sm:$0xff]   ;;  %v1670_v3 = vld [vmem:[#allocation5 + $0x110] ss:$8 sps:$4 sm:$0xff]   ;;  %v1671_v4 = vld [vmem:[#allocation5 + $0x124] ss:$8 sps:$4 sm:$0xff]  }
  0x4d   :  { %934 = vmatpush1.bf16.msra.mxu0 %v1667_v1  ;;  %v1673_v5 = vld [vmem:[#allocation5 + $0x120] ss:$8 sps:$4 sm:$0xff]   ;;  %v1674_v6 = vld [vmem:[#allocation5 + $0x134] ss:$8 sps:$4 sm:$0xff]   ;;  %v1676_v7 = vld [vmem:[#allocation5 + $0x130] ss:$8 sps:$4 sm:$0xff]  }
  0x4e   :  { %935 = vmatprep.subr.bf16.mxu0 %v1668_v2  ;;  %v1677_v8 = vld [vmem:[#allocation5 + $0x144] ss:$8 sps:$4 sm:$0xff]   ;;  %v1679_v9 = vld [vmem:[#allocation5 + $0x140] ss:$8 sps:$4 sm:$0xff]   ;;  %v1680_v10 = vld [vmem:[#allocation5 + $0x154] ss:$8 sps:$4 sm:$0xff]  }
  0x4f   :  { %v1682_v11 = vld [vmem:[#allocation5 + $0x150] ss:$8 sps:$4 sm:$0xff]   ;;  %v1683_v12 = vld [vmem:[#allocation5 + $0x164] ss:$8 sps:$4 sm:$0xff]   ;;  %v1685_v16 = vld [vmem:[#allocation5 + $0x160] ss:$8 sps:$4 sm:$0xff]  }
  0x50   :  { %v89_v13 = vld [vmem:[#allocation2 + $0x18] sm:$0xff]  ;;  %v1689_v19 = vld [vmem:[#allocation5 + $0x184] ss:$8 sps:$4 sm:$0xff]   ;;  %v1691_v20 = vld [vmem:[#allocation5 + $0x180] ss:$8 sps:$4 sm:$0xff]   ;;  %vm2033_vm0 = vmmov 0  }
  0x51   :  { %936 = vmatpush1.bf16.msra.mxu0 %v1670_v3  ;;  %v97_v14 = vld [vmem:[#allocation2 + $0x58] sm:$0xff]  ;;  %v1695_v23 = vld [vmem:[#allocation5 + $0x1a4] ss:$8 sps:$4 sm:$0xff]   ;;  %v1697_v24 = vld [vmem:[#allocation5 + $0x1a0] ss:$8 sps:$4 sm:$0xff]   ;;  %s2034_s13 = smov [#allocation11]  }
  0x52   :  { %937 = vmatprep.subr.bf16.mxu0 %v1671_v4  ;;  %v105_v15 = vpack.c.bf16 %v97_v14, %v89_v13  ;;  %v1686_v17 = vld [vmem:[#allocation5 + $0x174] ss:$8 sps:$4 sm:$0xff]   ;;  %v1688_v18 = vld [vmem:[#allocation5 + $0x170] ss:$8 sps:$4 sm:$0xff]   ;;  %v1758_v27 = vld [vmem:[#allocation5 + $0x4] ss:$8 sps:$4 sm:$0xff]  }
  0x53   :  { %v1692_v21 = vld [vmem:[#allocation5 + $0x194] ss:$8 sps:$4 sm:$0xff]   ;;  %v1694_v22 = vld [vmem:[#allocation5 + $0x190] ss:$8 sps:$4 sm:$0xff]   ;;  %v1760_v28 = vld [vmem:[#allocation5] ss:$8 sps:$4 sm:$0xff]   ;;  %890 = vmatprep.subr.bf16.mxu1 %v1758_v27 }
  0x54   :  { %965 = vmatprep.mubr.bf16.mxu0 %v105_v15  ;;  %v1698_v25 = vld [vmem:[#allocation5 + $0x1b4] ss:$8 sps:$4 sm:$0xff]   ;;  %v1700_v26 = vld [vmem:[#allocation5 + $0x1b0] ss:$8 sps:$4 sm:$0xff]   ;;  %v1701_v29 = vld [vmem:[#allocation5 + $0x1c4] ss:$8 sps:$4 sm:$0xff]   ;;  %891 = vmatpush1.bf16.msra.mxu1 %v1760_v28 }
  0x55   :  { %938 = vmatpush1.bf16.msra.mxu0 %v1673_v5  ;;  %v1764_v30 = vld [vmem:[#allocation5 + $0x14] ss:$8 sps:$4 sm:$0xff]   ;;  %v1766_v31 = vld [vmem:[#allocation5 + $0x10] ss:$8 sps:$4 sm:$0xff]   ;;  %v1703_v32 = vld [vmem:[#allocation5 + $0x1c0] ss:$8 sps:$4 sm:$0xff]  }
  0x56   :  { %939 = vmatprep.subr.bf16.mxu0 %v1674_v6  ;;  %v1704_v33 = vld [vmem:[#allocation5 + $0x1d4] ss:$8 sps:$4 sm:$0xff]   ;;  %892 = vmatprep.subr.bf16.mxu1 %v1764_v30  ;;  %v1770_v34 = vld [vmem:[#allocation5 + $0x24] ss:$8 sps:$4 sm:$0xff]   ;;  %v1772_v35 = vld [vmem:[#allocation5 + $0x20] ss:$8 sps:$4 sm:$0xff]  }
  0x57   :  { %v1706_v36 = vld [vmem:[#allocation5 + $0x1d0] ss:$8 sps:$4 sm:$0xff]   ;;  %v1707_v37 = vld [vmem:[#allocation5 + $0x1e4] ss:$8 sps:$4 sm:$0xff]   ;;  %v1776_v38 = vld [vmem:[#allocation5 + $0x34] ss:$8 sps:$4 sm:$0xff]  }
  0x58   :  { %893 = vmatpush1.bf16.msra.mxu1 %v1766_v31  ;;  %v1778_v39 = vld [vmem:[#allocation5 + $0x30] ss:$8 sps:$4 sm:$0xff]   ;;  %v1709_v40 = vld [vmem:[#allocation5 + $0x1e0] ss:$8 sps:$4 sm:$0xff]   ;;  %v1782_v41 = vld [vmem:[#allocation5 + $0x44] ss:$8 sps:$4 sm:$0xff]  }
  0x59   :  { %940 = vmatpush1.bf16.msra.mxu0 %v1676_v7  ;;  %894 = vmatprep.subr.bf16.mxu1 %v1770_v34  ;;  %v1710_v42 = vld [vmem:[#allocation5 + $0x1f4] ss:$8 sps:$4 sm:$0xff]   ;;  %v1712_v43 = vld [vmem:[#allocation5 + $0x1f0] ss:$8 sps:$4 sm:$0xff]   ;;  %v1715_v45 = vld [vmem:[#allocation5 + $0x204] ss:$8 sps:$4 sm:$0xff]  }
  0x5a   :  { %941 = vmatprep.subr.bf16.mxu0 %v1677_v8  ;;  %v88_v44 = vld [vmem:[#allocation2 + $0x10] sm:$0xff]  ;;  %v1784_v47 = vld [vmem:[#allocation5 + $0x40] ss:$8 sps:$4 sm:$0xff]   ;;  %v1794_v56 = vld [vmem:[#allocation5 + $0x64] ss:$8 sps:$4 sm:$0xff]   ;;  %s1395_s14 = sshll.u32 %s2034_s13, 4  ;;  %s1396_s14 = int_to_ptr.vmem [resolvable:$true] %s1395_s14 }
  0x5b   :  { %v96_v46 = vld [vmem:[#allocation2 + $0x50] sm:$0xff]  ;;  %v91_v48 = vld [vmem:[#allocation2 + $0x28] sm:$0xff]  ;;  %v94_v34 = vld [vmem:[#allocation2 + $0x40] sm:$0xff]  ;;  %s1969_s15 = scalar_lea.vmem %s1396_s14, 128  ;;  %p1974_p5 = scmp.lt.s32.totalorder %s1396_s14, %s1396_s14 }
  0x5c   :  { %895 = vmatpush1.bf16.msra.mxu1 %v1772_v35  ;;  %v1788_v49 = vld [vmem:[#allocation5 + $0x54] ss:$8 sps:$4 sm:$0xff]   ;;  %v99_v50 = vld [vmem:[#allocation2 + $0x68] sm:$0xff]  ;;  %v104_v51 = vpack.c.bf16 %v96_v46, %v88_v44  ;;  %v1790_v52 = vld [vmem:[#allocation5 + $0x50] ss:$8 sps:$4 sm:$0xff]   ;;  %p1970_p4 = scmp.ne.s32.totalorder %s1396_s14, %s1969_s15  ;;  %p1975_p6 = scmp.lt.s32.totalorder %s1969_s15, %s1969_s15 }
  0x5d   :  { %942 = vmatpush1.bf16.msra.mxu0 %v1679_v9  ;;  %896 = vmatprep.subr.bf16.mxu1 %v1776_v38  ;;  %v1713_v53 = vld [vmem:[#allocation5 + $0x200] ss:$8 sps:$4 sm:$0xff]   ;;  %v1718_v54 = vld [vmem:[#allocation5 + $0x214] ss:$8 sps:$4 sm:$0xff]   ;;  %v107_v55 = vpack.c.bf16 %v99_v50, %v91_v48  ;;  %v1716_v58 = vld [vmem:[#allocation5 + $0x210] ss:$8 sps:$4 sm:$0xff]  }
  0x5e   :  { %943 = vmatprep.subr.bf16.mxu0 %v1680_v10  ;;  %v1796_v57 = vld [vmem:[#allocation5 + $0x60] ss:$8 sps:$4 sm:$0xff]   ;;  %v1800_v59 = vld [vmem:[#allocation5 + $0x74] ss:$8 sps:$4 sm:$0xff]   ;;  %v1721_v60 = vld [vmem:[#allocation5 + $0x224] ss:$8 sps:$4 sm:$0xff]   ;;  %p1976_p7 = por %p1975_p6, %p1974_p5 }
  0x5f   :  { %v1802_v61 = vld [vmem:[#allocation5 + $0x70] ss:$8 sps:$4 sm:$0xff]   ;;  %v1719_v62 = vld [vmem:[#allocation5 + $0x220] ss:$8 sps:$4 sm:$0xff]   ;;  %v1806_v63 = vld [vmem:[#allocation5 + $0x84] ss:$8 sps:$4 sm:$0xff]  }
  0x60   :  { %897 = vmatpush1.bf16.msra.mxu1 %v1778_v39  ;;  %v1724_v0 = vld [vmem:[#allocation5 + $0x234] ss:$8 sps:$4 sm:$0xff]   ;;  %v1808_v1 = vld [vmem:[#allocation5 + $0x80] ss:$8 sps:$4 sm:$0xff]   ;;  %v1722_v2 = vld [vmem:[#allocation5 + $0x230] ss:$8 sps:$4 sm:$0xff]   ;;  %p1977_p8 = pnand %p1976_p7, %p1970_p4 }
  0x61   :  { %944 = vmatpush1.bf16.msra.mxu0 %v1682_v11  ;;  %898 = vmatprep.subr.bf16.mxu1 %v1782_v41  ;;  %v1812_v3 = vld [vmem:[#allocation5 + $0x94] ss:$8 sps:$4 sm:$0xff]   ;;  %v1727_v4 = vld [vmem:[#allocation5 + $0x244] ss:$8 sps:$4 sm:$0xff]   ;;  %v1814_v5 = vld [vmem:[#allocation5 + $0x90] ss:$8 sps:$4 sm:$0xff]  }
  0x62   :  { %945 = vmatprep.subr.bf16.mxu0 %v1683_v12  ;;  %v1725_v6 = vld [vmem:[#allocation5 + $0x240] ss:$8 sps:$4 sm:$0xff]   ;;  %v1818_v7 = vld [vmem:[#allocation5 + $0xa4] ss:$8 sps:$4 sm:$0xff]   ;;  %v1730_v8 = vld [vmem:[#allocation5 + $0x254] ss:$8 sps:$4 sm:$0xff]  }
  0x63   :  { %v1820_v9 = vld [vmem:[#allocation5 + $0xa0] ss:$8 sps:$4 sm:$0xff]   ;;  %v1728_v10 = vld [vmem:[#allocation5 + $0x250] ss:$8 sps:$4 sm:$0xff]   ;;  %v1824_v11 = vld [vmem:[#allocation5 + $0xb4] ss:$8 sps:$4 sm:$0xff]  }
  0x64   :  { %899 = vmatpush1.bf16.msra.mxu1 %v1784_v47  ;;  %v1733_v12 = vld [vmem:[#allocation5 + $0x264] ss:$8 sps:$4 sm:$0xff]   ;;  %v1826_v13 = vld [vmem:[#allocation5 + $0xb0] ss:$8 sps:$4 sm:$0xff]   ;;  %v1731_v15 = vld [vmem:[#allocation5 + $0x260] ss:$8 sps:$4 sm:$0xff]  }
  0x65   :  { %946 = vmatpush1.bf16.msra.mxu0 %v1685_v16  ;;  %900 = vmatprep.subr.bf16.mxu1 %v1788_v49  ;;  %v87_v14 = vld [vmem:[#allocation2 + $0x8] sm:$0xff]  ;;  %v1742_v27 = vld [vmem:[#allocation5 + $0x294] ss:$8 sps:$4 sm:$0xff]   ;;  %v1740_v28 = vld [vmem:[#allocation5 + $0x290] ss:$8 sps:$4 sm:$0xff]  }
  0x66   :  { %947 = vmatprep.subr.bf16.mxu0 %v1686_v17  ;;  %v1830_v16 = vld [vmem:[#allocation5 + $0xc4] ss:$8 sps:$4 sm:$0xff]   ;;  %v1844_v30 = vld [vmem:[#allocation5 + $0xe0] ss:$8 sps:$4 sm:$0xff]   ;;  %v1848_v31 = vld [vmem:[#allocation5 + $0xf4] ss:$8 sps:$4 sm:$0xff]  }
  0x67   :  { %v95_v17 = vld [vmem:[#allocation2 + $0x48] sm:$0xff]  ;;  %v1858_v38 = vld [vmem:[#allocation7] sm:$0xff]   ;;  %v1746_v39 = vld [vmem:[#allocation5 + $0x2b0] ss:$8 sps:$4 sm:$0xff]  }
  0x68   :  { %901 = vmatpush1.bf16.msra.mxu1 %v1790_v52  ;;  %v1743_v35 = vld [vmem:[#allocation5 + $0x2a0] ss:$8 sps:$4 sm:$0xff]   ;;  %v1754_v46 = vld [vmem:[#allocation5 + $0x2d4] ss:$8 sps:$4 sm:$0xff]   ;;  %v1752_v48 = vld [vmem:[#allocation5 + $0x2d0] ss:$8 sps:$4 sm:$0xff]  }
  0x69   :  { %948 = vmatpush1.bf16.msra.mxu0 %v1688_v18  ;;  %902 = vmatprep.subr.bf16.mxu1 %v1794_v56  ;;  %v1736_v18 = vld [vmem:[#allocation5 + $0x274] ss:$8 sps:$4 sm:$0xff]   ;;  %v1859_v41 = vld [vmem:[#allocation7 + $0x48] sm:$0xff]   ;;  %v98_v56 = vld [vmem:[#allocation2 + $0x60] sm:$0xff] }
  0x6a   :  { %949 = vmatprep.subr.bf16.mxu0 %v1689_v19  ;;  %v103_v19 = vpack.c.bf16 %v95_v17, %v87_v14  ;;  %v1749_v44 = vld [vmem:[#allocation5 + $0x2c0] ss:$8 sps:$4 sm:$0xff]   ;;  %v1862_v47 = vld [vmem:[#allocation7 + $0x10] sm:$0xff]   ;;  %v1863_v49 = vld [vmem:[#allocation7 + $0x58] sm:$0xff]  }
  0x6b   :  { %v1757_v50 = vld [vmem:[#allocation5 + $0x2e4] ss:$8 sps:$4 sm:$0xff]   ;;  %v1755_v52 = vld [vmem:[#allocation5 + $0x2e0] ss:$8 sps:$4 sm:$0xff]  }
  0x6c   :  { %903 = vmatpush1.bf16.msra.mxu1 %v1796_v57  ;;  %922 = vmatprep.mubr.bf16.mxu1 %v103_v19  ;;  %v1769_v57 = vld [vmem:[#allocation5 + $0x304] ss:$8 sps:$4 sm:$0xff]   ;;  %v1815_v14 = vld [vmem:[#allocation5 + $0x380] ss:$8 sps:$4 sm:$0xff]   ;;  %v1835_v19 = vld [vmem:[#allocation5 + $0x3b4] ss:$8 sps:$4 sm:$0xff]  }
  0x6d   :  { %950 = vmatpush1.bf16.msra.mxu0 %v1691_v20  ;;  %904 = vmatprep.subr.bf16.mxu1 %v1800_v59  ;;  %v1734_v20 = vld [vmem:[#allocation5 + $0x270] ss:$8 sps:$4 sm:$0xff]   ;;  %v1829_v17 = vld [vmem:[#allocation5 + $0x3a4] ss:$8 sps:$4 sm:$0xff]  }
  0x6e   :  { %951 = vmatprep.subr.bf16.mxu0 %v1692_v21  ;;  %v1832_v21 = vld [vmem:[#allocation5 + $0xc0] ss:$8 sps:$4 sm:$0xff]   ;;  %v101_v59 = vld [vmem:[#allocation2 + $0x78] sm:$0xff] }
  0x70   :  { %905 = vmatpush1.bf16.msra.mxu1 %v1802_v61  ;;  %v1767_v61 = vld [vmem:[#allocation5 + $0x300] ss:$8 sps:$4 sm:$0xff]  }
  0x71   :  { %952 = vmatpush1.bf16.msra.mxu0 %v1694_v22  ;;  %906 = vmatprep.subr.bf16.mxu1 %v1806_v63  ;;  %v1836_v22 = vld [vmem:[#allocation5 + $0xd4] ss:$8 sps:$4 sm:$0xff]  }
  0x72   :  { %953 = vmatprep.subr.bf16.mxu0 %v1695_v23  ;;  %v1739_v23 = vld [vmem:[#allocation5 + $0x284] ss:$8 sps:$4 sm:$0xff]   ;;  %v1775_v63 = vld [vmem:[#allocation5 + $0x314] ss:$8 sps:$4 sm:$0xff]  }
  0x74   :  { %907 = vmatpush1.bf16.msra.mxu1 %v1808_v1  ;;  %v1781_v1 = vld [vmem:[#allocation5 + $0x324] ss:$8 sps:$4 sm:$0xff]  }
  0x75   :  { %954 = vmatpush1.bf16.msra.mxu0 %v1697_v24  ;;  %908 = vmatprep.subr.bf16.mxu1 %v1812_v3  ;;  %v1737_v24 = vld [vmem:[#allocation5 + $0x280] ss:$8 sps:$4 sm:$0xff]   ;;  %v1787_v3 = vld [vmem:[#allocation5 + $0x334] ss:$8 sps:$4 sm:$0xff]  }
  0x76   :  { %955 = vmatprep.subr.bf16.mxu0 %v1698_v25  ;;  %v1838_v25 = vld [vmem:[#allocation5 + $0xd0] ss:$8 sps:$4 sm:$0xff]  }
  0x78   :  { %909 = vmatpush1.bf16.msra.mxu1 %v1814_v5  ;;  %v1793_v5 = vld [vmem:[#allocation5 + $0x344] ss:$8 sps:$4 sm:$0xff]  }
  0x79   :  { %956 = vmatpush1.bf16.msra.mxu0 %v1700_v26  ;;  %910 = vmatprep.subr.bf16.mxu1 %v1818_v7  ;;  %v1842_v26 = vld [vmem:[#allocation5 + $0xe4] ss:$8 sps:$4 sm:$0xff]   ;;  %v1799_v7 = vld [vmem:[#allocation5 + $0x354] ss:$8 sps:$4 sm:$0xff]  }
  0x7a   :  { %957 = vmatprep.subr.bf16.mxu0 %v1701_v29  ;;  %v1745_v29 = vld [vmem:[#allocation5 + $0x2a4] ss:$8 sps:$4 sm:$0xff]  }
  0x7c   :  { %911 = vmatpush1.bf16.msra.mxu1 %v1820_v9  ;;  %v1805_v9 = vld [vmem:[#allocation5 + $0x364] ss:$8 sps:$4 sm:$0xff]  }
  0x7d   :  { %958 = vmatpush1.bf16.msra.mxu0 %v1703_v32  ;;  %912 = vmatprep.subr.bf16.mxu1 %v1824_v11  ;;  %v1850_v32 = vld [vmem:[#allocation5 + $0xf0] ss:$8 sps:$4 sm:$0xff]   ;;  %v1811_v11 = vld [vmem:[#allocation5 + $0x374] ss:$8 sps:$4 sm:$0xff]  }
  0x7e   :  { %959 = vmatprep.subr.bf16.mxu0 %v1704_v33  ;;  %v86_v33 = vld [vmem:[#allocation2] sm:$0xff] }
  0x80   :  { %913 = vmatpush1.bf16.msra.mxu1 %v1826_v13  ;;  %v1817_v13 = vld [vmem:[#allocation5 + $0x384] ss:$8 sps:$4 sm:$0xff]  }
  0x81   :  { %960 = vmatpush1.bf16.msra.mxu0 %v1706_v36  ;;  %914 = vmatprep.subr.bf16.mxu1 %v1830_v16  ;;  %v1857_v36 = vld [vmem:[#allocation7 + $0x40] sm:$0xff]   ;;  %v1821_v16 = vld [vmem:[#allocation5 + $0x390] ss:$8 sps:$4 sm:$0xff]  }
  0x82   :  { %961 = vmatprep.subr.bf16.mxu0 %v1707_v37  ;;  %v1748_v37 = vld [vmem:[#allocation5 + $0x2b4] ss:$8 sps:$4 sm:$0xff]  }
  0x84   :  { %915 = vmatpush1.bf16.msra.mxu1 %v1832_v21  ;;  %v1841_v21 = vld [vmem:[#allocation5 + $0x3c4] ss:$8 sps:$4 sm:$0xff]  }
  0x85   :  { %962 = vmatpush1.bf16.msra.mxu0 %v1709_v40  ;;  %916 = vmatprep.subr.bf16.mxu1 %v1836_v22  ;;  %v102_v40 = vpack.c.bf16 %v94_v34, %v86_v33  ;;  %v1839_v22 = vld [vmem:[#allocation5 + $0x3c0] ss:$8 sps:$4 sm:$0xff]  }
  0x86   :  { %963 = vmatprep.subr.bf16.mxu0 %v1710_v42  ;;  %v1751_v42 = vld [vmem:[#allocation5 + $0x2c4] ss:$8 sps:$4 sm:$0xff]  }
  0x87   :  { %v1866_v33 = vld [vmem:[#allocation7 + $0x20] sm:$0xff]   ;;  %v1867_v34 = vld [vmem:[#allocation7 + $0x68] sm:$0xff]  }
  0x88   :  { %917 = vmatpush1.bf16.msra.mxu1 %v1838_v25  ;;  %v1853_v25 = vld [vmem:[#allocation5 + $0x3e4] ss:$8 sps:$4 sm:$0xff]  }
  0x89   :  { %964 = vmatpush1.bf16.msra.mxu0 %v1712_v43  ;;  %918 = vmatprep.subr.bf16.mxu1 %v1842_v26  ;;  %v1860_v43 = vld [vmem:[#allocation7 + $0x8] sm:$0xff]  }
  0x8a   :  { %976 = vmatprep.subr.bf16.mxu0 %v1715_v45  ;;  %v1861_v45 = vld [vmem:[#allocation7 + $0x50] sm:$0xff]   ;;  %v1851_v26 = vld [vmem:[#allocation5 + $0x3e0] ss:$8 sps:$4 sm:$0xff]  }
  0x8c   :  { %966 = vmatmul.mubr.bf16.vlgmr.msra.gmra.mrb[0].mxu0 %v104_v51  ;;  %919 = vmatpush1.bf16.msra.mxu1 %v1844_v30  ;;  %v1864_v51 = vld [vmem:[#allocation7 + $0x18] sm:$0xff]   ;;  %v100_v30 = vld [vmem:[#allocation2 + $0x70] sm:$0xff] }
  0x8d   :  { %977 = vmatpush1.bf16.msra.mxu0 %v1713_v53  ;;  %1008 = vmatprep.mubr.bf16.mxu0 %v107_v55  ;;  %v1763_v53 = vld [vmem:[#allocation5 + $0x2f4] ss:$8 sps:$4 sm:$0xff]   ;;  %v90_v55 = vld [vmem:[#allocation2 + $0x20] sm:$0xff] }
  0x8e   :  { %978 = vmatprep.subr.bf16.mxu0 %v1718_v54  ;;  %920 = vmatprep.subr.bf16.mxu1 %v1848_v31  ;;  %v1761_v54 = vld [vmem:[#allocation5 + $0x2f0] ss:$8 sps:$4 sm:$0xff]  }
  0x90   :  { %921 = vmatpush1.bf16.msra.mxu1 %v1850_v32  ;;  %v1865_v32 = vld [vmem:[#allocation7 + $0x60] sm:$0xff]  }
  0x91   :  { %979 = vmatpush1.bf16.msra.mxu0 %v1716_v58  ;;  %1585 = vmatprep.subr.bf16.mxu1 %v1857_v36  ;;  %v93_v58 = vld [vmem:[#allocation2 + $0x38] sm:$0xff]  ;;  %v1869_v36 = vld [vmem:[#allocation7 + $0x70] sm:$0xff]  }
  0x92   :  { %980 = vmatprep.subr.bf16.mxu0 %v1721_v60  ;;  %v106_v60 = vpack.c.bf16 %v98_v56, %v90_v55 }
  0x93   :  { %923 = vmatmul.mubr.bf16.vlgmr.msra.gmra.mrb[0].mxu1 %v102_v40  ;;  %v2032_v40 = vmov 0.0  }
  0x94   :  { %1586 = vmatpush3.bf16.msra.mxu1 %v1858_v38  ;;  %v1871_v38 = vld [vmem:[#allocation7 + $0x78] sm:$0xff]  }
  0x95   :  { %981 = vmatpush1.bf16.msra.mxu0 %v1719_v62  ;;  %1587 = vmatprep.subr.bf16.mxu1 %v1859_v41  ;;  %v109_v62 = vpack.c.bf16 %v101_v59, %v93_v58 }
  0x96   :  { %982 = vmatprep.subr.bf16.mxu0 %v1724_v0  ;;  %v1773_v0 = vld [vmem:[#allocation5 + $0x310] ss:$8 sps:$4 sm:$0xff]  }
  0x98   :  { %1588 = vmatpush3.bf16.msra.mxu1 %v1860_v43 }
  0x99   :  { %983 = vmatpush1.bf16.msra.mxu0 %v1722_v2  ;;  %1589 = vmatprep.subr.bf16.mxu1 %v1861_v45  ;;  %v1779_v2 = vld [vmem:[#allocation5 + $0x320] ss:$8 sps:$4 sm:$0xff]   ;;  %v240_v45 = vlaneseq }
  0x9a   :  { %984 = vmatprep.subr.bf16.mxu0 %v1727_v4  ;;  %v1785_v4 = vld [vmem:[#allocation5 + $0x330] ss:$8 sps:$4 sm:$0xff]  }
  0x9c   :  { %1590 = vmatpush3.bf16.msra.mxu1 %v1862_v47 }
  0x9d   :  { %985 = vmatpush1.bf16.msra.mxu0 %v1725_v6  ;;  %1591 = vmatprep.subr.bf16.mxu1 %v1863_v49  ;;  %v1791_v6 = vld [vmem:[#allocation5 + $0x340] ss:$8 sps:$4 sm:$0xff]  }
  0x9e   :  { %986 = vmatprep.subr.bf16.mxu0 %v1730_v8  ;;  %v1797_v8 = vld [vmem:[#allocation5 + $0x350] ss:$8 sps:$4 sm:$0xff]  }
  0xa0   :  { %1592 = vmatpush3.bf16.msra.mxu1 %v1864_v51 }
  0xa1   :  { %987 = vmatpush1.bf16.msra.mxu0 %v1728_v10  ;;  %v1803_v10 = vld [vmem:[#allocation5 + $0x360] ss:$8 sps:$4 sm:$0xff]   ;;  %1593 = vmatprep.subr.bf16.mxu1 %v1865_v32 }
  0xa2   :  { %988 = vmatprep.subr.bf16.mxu0 %v1733_v12  ;;  %v1809_v12 = vld [vmem:[#allocation5 + $0x370] ss:$8 sps:$4 sm:$0xff]  }
  0xa4   :  { %1594 = vmatpush3.bf16.msra.mxu1 %v1866_v33 }
  0xa5   :  { %989 = vmatpush1.bf16.msra.mxu0 %v1731_v15  ;;  %v1823_v15 = vld [vmem:[#allocation5 + $0x394] ss:$8 sps:$4 sm:$0xff]   ;;  %1595 = vmatprep.subr.bf16.mxu1 %v1867_v34 }
  0xa6   :  { %990 = vmatprep.subr.bf16.mxu0 %v1736_v18  ;;  %v1827_v18 = vld [vmem:[#allocation5 + $0x3a0] ss:$8 sps:$4 sm:$0xff]  }
  0xa9   :  { %991 = vmatpush1.bf16.msra.mxu0 %v1734_v20  ;;  %v1833_v20 = vld [vmem:[#allocation5 + $0x3b0] ss:$8 sps:$4 sm:$0xff]  }
  0xaa   :  { %992 = vmatprep.subr.bf16.mxu0 %v1739_v23  ;;  %v1847_v23 = vld [vmem:[#allocation5 + $0x3d4] ss:$8 sps:$4 sm:$0xff]  }
  0xad   :  { %993 = vmatpush1.bf16.msra.mxu0 %v1737_v24  ;;  %v1845_v24 = vld [vmem:[#allocation5 + $0x3d0] ss:$8 sps:$4 sm:$0xff]  }
  0xae   :  { %994 = vmatprep.subr.bf16.mxu0 %v1742_v27  ;;  %v1856_v27 = vld [vmem:[#allocation5 + $0x3f4] ss:$8 sps:$4 sm:$0xff]  }
  0xb1   :  { %995 = vmatpush1.bf16.msra.mxu0 %v1740_v28  ;;  %v1854_v28 = vld [vmem:[#allocation5 + $0x3f0] ss:$8 sps:$4 sm:$0xff]  }
  0xb2   :  { %996 = vmatprep.subr.bf16.mxu0 %v1745_v29  ;;  %v92_v29 = vld [vmem:[#allocation2 + $0x30] sm:$0xff] }
  0xb3   :  { %v108_v31 = vpack.c.bf16 %v100_v30, %v92_v29 }
  0xb5   :  { %997 = vmatpush1.bf16.msra.mxu0 %v1743_v35  ;;  %v1868_v35 = vld [vmem:[#allocation7 + $0x28] sm:$0xff]  }
  0xb6   :  { %998 = vmatprep.subr.bf16.mxu0 %v1748_v37  ;;  %1596 = vmatpush3.bf16.msra.mxu1 %v1868_v35  ;;  %v1870_v37 = vld [vmem:[#allocation7 + $0x30] sm:$0xff]  }
  0xb7   :  { %1597 = vmatprep.subr.bf16.mxu1 %v1869_v36 }
  0xb9   :  { %999 = vmatpush1.bf16.msra.mxu0 %v1746_v39  ;;  %v1872_v39 = vld [vmem:[#allocation7 + $0x38] sm:$0xff]  }
  0xba   :  { %1000 = vmatprep.subr.bf16.mxu0 %v1751_v42  ;;  %1598 = vmatpush3.bf16.msra.mxu1 %v1870_v37 }
  0xbb   :  { %1599 = vmatprep.subr.bf16.mxu1 %v1871_v38 }
  0xbd   :  { %1001 = vmatpush1.bf16.msra.mxu0 %v1749_v44 }
  0xbe   :  { %1002 = vmatprep.subr.bf16.mxu0 %v1754_v46  ;;  %1600 = vmatpush3.bf16.msra.mxu1 %v1872_v39  ;;  %v241_v46 = vshrl.u32 %v240_v45, 7 }
  0xbf   :  { %1616 = vmatprep.subr.bf16.mxu1 %v2032_v40 }
  0xc0   :  { %v242_v47 = vsub.s32 0, %v241_v46  ;;  %v246_v49 = vsub.s32 1, %v241_v46 }
  0xc1   :  { %1003 = vmatpush1.bf16.msra.mxu0 %v1752_v48  ;;  %v238_v48 = vld [vmem:[%s2177_s2] sm:$0x3] }
  0xc2   :  { %1004 = vmatprep.subr.bf16.mxu0 %v1757_v50  ;;  %v243_v50 = vrot.slane %v238_v48, %v242_v47  ;;  %v247_v51 = vrot.slane %v238_v48, %v246_v49 }
  0xc5   :  { %1005 = vmatpush1.bf16.msra.mxu0 %v1755_v52 }
  0xc6   :  { %1006 = vmatprep.subr.bf16.mxu0 %v1763_v53 }
  0xc9   :  { %1007 = vmatpush1.bf16.msra.mxu0 %v1761_v54 }
  0xca   :  { %1019 = vmatprep.subr.bf16.mxu0 %v1769_v57 }
  0xcc   :  { %1009 = vmatmul.mubr.bf16.vlgmr.msra.gmra.mrb[0].mxu0 %v106_v60 }
  0xcd   :  { %1020 = vmatpush1.bf16.msra.mxu0 %v1767_v61  ;;  %1051 = vmatprep.mubr.bf16.mxu0 %v109_v62 }
  0xce   :  { %1021 = vmatprep.subr.bf16.mxu0 %v1775_v63 }
  0xd1   :  { %1022 = vmatpush1.bf16.msra.mxu0 %v1773_v0 }
  0xd2   :  { %1023 = vmatprep.subr.bf16.mxu0 %v1781_v1 }
  0xd5   :  { %1024 = vmatpush1.bf16.msra.mxu0 %v1779_v2 }
  0xd6   :  { %1025 = vmatprep.subr.bf16.mxu0 %v1787_v3 }
  0xd9   :  { %1026 = vmatpush1.bf16.msra.mxu0 %v1785_v4 }
  0xda   :  { %1027 = vmatprep.subr.bf16.mxu0 %v1793_v5 }
  0xdd   :  { %1028 = vmatpush1.bf16.msra.mxu0 %v1791_v6  ;;  %v1873_v6 = vld [vmem:[#allocation8] sm:$0xff]  }
  0xde   :  { %1029 = vmatprep.subr.bf16.mxu0 %v1799_v7  ;;  %v1874_v7 = vld [vmem:[#allocation8 + $0x8] sm:$0xff]  }
  0xe1   :  { %1030 = vmatpush1.bf16.msra.mxu0 %v1797_v8  ;;  %v1875_v8 = vld [vmem:[#allocation8 + $0x10] sm:$0xff]  }
  0xe2   :  { %1031 = vmatprep.subr.bf16.mxu0 %v1805_v9  ;;  %v1876_v9 = vld [vmem:[#allocation8 + $0x18] sm:$0xff]  }
  0xe5   :  { %1032 = vmatpush1.bf16.msra.mxu0 %v1803_v10  ;;  %v1877_v10 = vld [vmem:[#allocation8 + $0x20] sm:$0xff]  }
  0xe6   :  { %1033 = vmatprep.subr.bf16.mxu0 %v1811_v11  ;;  %v1878_v11 = vld [vmem:[#allocation8 + $0x28] sm:$0xff]  }
  0xe9   :  { %1034 = vmatpush1.bf16.msra.mxu0 %v1809_v12  ;;  %v1879_v12 = vld [vmem:[#allocation8 + $0x30] sm:$0xff]  }
  0xea   :  { %1035 = vmatprep.subr.bf16.mxu0 %v1817_v13  ;;  %v1880_v13 = vld [vmem:[#allocation8 + $0x38] sm:$0xff]  }
  0xed   :  { %1036 = vmatpush1.bf16.msra.mxu0 %v1815_v14 }
  0xee   :  { %1037 = vmatprep.subr.bf16.mxu0 %v1823_v15  ;;  %v1541_v15 = vld [vmem:[%s2179_s4] ss:$0 sm:$0xff] }
  0xf1   :  { %1038 = vmatpush1.bf16.msra.mxu0 %v1821_v16 }
  0xf2   :  { %1039 = vmatprep.subr.bf16.mxu0 %v1829_v17 }
  0xf5   :  { %1040 = vmatpush1.bf16.msra.mxu0 %v1827_v18 }
  0xf6   :  { %1041 = vmatprep.subr.bf16.mxu0 %v1835_v19 }
  0xf9   :  { %1042 = vmatpush1.bf16.msra.mxu0 %v1833_v20 }
  0xfa   :  { %1043 = vmatprep.subr.bf16.mxu0 %v1841_v21 }
  0xfd   :  { %1044 = vmatpush1.bf16.msra.mxu0 %v1839_v22 }
  0xfe   :  { %1045 = vmatprep.subr.bf16.mxu0 %v1847_v23 }
 0x101   :  { %1046 = vmatpush1.bf16.msra.mxu0 %v1845_v24 }
 0x102   :  { %1047 = vmatprep.subr.bf16.mxu0 %v1853_v25 }
 0x105   :  { %1048 = vmatpush1.bf16.msra.mxu0 %v1851_v26 }
 0x106   :  { %1049 = vmatprep.subr.bf16.mxu0 %v1856_v27 }
 0x109   :  { %1050 = vmatpush1.bf16.msra.mxu0 %v1854_v28 }
 0x10c   :  { %1052 = vmatmul.mubr.bf16.vlgmr.msra.gmra.mrb[0].mxu0 %v108_v31 }
 0x166   :  { %v924_v41 = vpop.f32.mrb[0].mxu1 }
 0x167   :  { %v926_v42 = vpop.f32.mrb[1].mxu1  ;;  %v925_v52 = vadd.f32 %v924_v41, %v243_v50 }
 0x168   :  { %v928_v43 = vpop.f32.mrb[2].mxu1  ;;  %v927_v53 = vadd.f32 %v926_v42, %v247_v51 }
 0x169   :  { %v930_v44 = vpop.f32.mrb[3].mxu1  ;;  %v929_v55 = vadd.f32 %v928_v43, %v243_v50 }
 0x16a   :  { %v931_v58 = vadd.f32 %v930_v44, %v247_v51 }
 0x1df   :  { %v1053_v54 = vpop.f32.mrb[0].mxu0 }
 0x1e0   :  { %v1637_v56 = vadd.f32 %v1053_v54, %v925_v52  ;;  %v1055_v57 = vpop.f32.mrb[1].mxu0 }
 0x1e1   :  { %v1639_v59 = vadd.f32 %v1055_v57, %v927_v53  ;;  %v1057_v60 = vpop.f32.mrb[2].mxu0 }
 0x1e2   :  { %v1641_v61 = vadd.f32 %v1057_v60, %v929_v55  ;;  %v1059_v62 = vpop.f32.mrb[3].mxu0  ;;  %v1062_v0 = vmax.f32 %v1637_v56, 0.0 }
 0x1e3   :  { %v1643_v63 = vadd.f32 %v1059_v62, %v931_v58  ;;  %v1063_v2 = vmax.f32 %v1639_v59, 0.0 }
 0x1e4   :  { %v1064_v1 = vmax.f32 %v1641_v61, 0.0 }
 0x1e5   :  { %v1065_v3 = vmax.f32 %v1643_v63, 0.0 }
 0x1e6   :  { %v1066_v4 = vpack.c.bf16 %v1064_v1, %v1062_v0 }
 0x1e7   :  { %v1067_v5 = vpack.c.bf16 %v1065_v3, %v1063_v2 }
 0x1e9   :  { %1235 = vmatprep.mubr.bf16.mxu1 %v1067_v5 }
 0x1ea   :  { %1236 = vmatmul.mubr.bf16.vlgmr.msra.gmra.mrb[4].mxu1 %v1066_v4 }
 0x1eb   :  { %1617 = vmatpush3.bf16.msra.mxu1 %v1873_v6  ;;  %1632 = vmatprep.mubr.msk.bf16.mxu1 %vm2033_vm0, %v2032_v40 }
 0x1ec   :  { %1618 = vmatprep.subr.bf16.mxu1 %v2032_v40 }
 0x1ef   :  { %1619 = vmatpush3.bf16.msra.mxu1 %v1874_v7 }
 0x1f0   :  { %1620 = vmatprep.subr.bf16.mxu1 %v2032_v40 }
 0x1f3   :  { %1621 = vmatpush3.bf16.msra.mxu1 %v1875_v8 }
 0x1f4   :  { %1622 = vmatprep.subr.bf16.mxu1 %v2032_v40 }
 0x1f7   :  { %1623 = vmatpush3.bf16.msra.mxu1 %v1876_v9 }
 0x1f8   :  { %1624 = vmatprep.subr.bf16.mxu1 %v2032_v40 }
 0x1fb   :  { %1625 = vmatpush3.bf16.msra.mxu1 %v1877_v10 }
 0x1fc   :  { %1626 = vmatprep.subr.bf16.mxu1 %v2032_v40 }
 0x1ff   :  { %1627 = vmatpush3.bf16.msra.mxu1 %v1878_v11 }
 0x200   :  { %1628 = vmatprep.subr.bf16.mxu1 %v2032_v40 }
 0x203   :  { %1629 = vmatpush3.bf16.msra.mxu1 %v1879_v12 }
 0x204   :  { %1630 = vmatprep.subr.bf16.mxu1 %v2032_v40 }
 0x207   :  { %1631 = vmatpush3.bf16.msra.mxu1 %v1880_v13 }
 0x2bd   :  { %v1601_v14 = vpop.f32.mrb[4].mxu1 }
 0x2be   :  { %v1602_v16 = vpop.f32.mrb[5].mxu1 }
 0x2bf   :  { %v1603_v17 = vadd.f32 %v1602_v16, %v1601_v14  ;;  %v1604_v18 = vpop.f32.mrb[6].mxu1 }
 0x2c0   :  { %v1605_v19 = vpop.f32.mrb[7].mxu1 }
 0x2c1   :  { %v1238_v20 = vadd.f32 %v1603_v17, %v1541_v15  ;;  %v1606_v21 = vadd.f32 %v1605_v19, %v1604_v18 }
 0x2c3   :  { %v1241_v22 = vadd.f32 %v1606_v21, %v1541_v15  ;;  %v1244_v23 = vmax.f32 %v1238_v20, 0.0 }
 0x2c5   :  { %v1245_v24 = vmax.f32 %v1241_v22, 0.0 }
 0x2c7   :  { %v1246_v25 = vpack.c.bf16 %v1245_v24, %v1244_v23 }
 0x2c9   :  { %1579 = vst [vmem:[#allocation11] sm:$0xff] %v1246_v25   ;;  %1633 = vmatmul.mubr.bf16.vlgmr.msra.gmra.mrb[8].mxu1 %v1246_v25 }
 0x2ca   :  { %1980 = shalt.err (!%p1977_p8)
}
 0x2cb   :  { %s1981_s17 = scalar_lea.hbm %s2183_s8, 128 }
 0x2cc   :  { %p1982_p9 = scmp.ne.s32.totalorder %s2183_s8, %s1981_s17  ;;  %p1985_p10 = scmp.lt.u32.totalorder %s1981_s17, %s2183_s8 }
 0x2ce   :  { %p1987_p11 = pnand %p1985_p10, %p1982_p9 }
 0x2d0   :  { %1990 = shalt.err (!%p1987_p11)
}
 0x2d1   :  { %1401 = dma.vmem_to_hbm [thread:$0]  %s1396_s14, 128, %s2183_s8, [#allocation12], %s2028_s28, %s2028_s28, %s2031_s20  }
 0x2d2   :  { %v1560_v26 = vld [vmem:[%s2181_s6] ss:$0 sm:$0xff]  ;;  %s2035_s26 = smov [#allocation10]  }
 0x2d3   :  { %s1383_s27 = sshll.u32 %s2035_s26, 4  ;;  %s1384_s27 = int_to_ptr.vmem [resolvable:$true] %s1383_s27 }
 0x2d4   :  { %s1991_s29 = scalar_lea.vmem %s1384_s27, 128  ;;  %p1996_p13 = scmp.lt.s32.totalorder %s1384_s27, %s1384_s27 }
 0x2d5   :  { %p1992_p12 = scmp.ne.s32.totalorder %s1384_s27, %s1991_s29  ;;  %p1997_p0 = scmp.lt.s32.totalorder %s1991_s29, %s1991_s29 }
 0x2d7   :  { %p1998_p1 = por %p1997_p0, %p1996_p13 }
 0x2d9   :  { %p1999_p2 = pnand %p1998_p1, %p1992_p12 }
 0x39c   :  { %v1361_v27 = vpop.f32.mrb[8].mxu1 }
 0x39d   :  { %v1634_v28 = vpop.f32.mrb[9].mxu1  ;;  %v1362_v30 = vadd.f32 %v1560_v26, %v1361_v27 }
 0x39e   :  { %v1364_v29 = vpop.f32.mrb[10].mxu1 }
 0x39f   :  { %v1365_v31 = vadd.f32 %v1560_v26, %v1364_v29  ;;  %v1635_v32 = vpop.f32.mrb[11].mxu1 }
 0x3a1   :  { %v1583_v33 = vpack.c.bf16 %v1365_v31, %v1362_v30 }
 0x3a3   :  { %1584 = vst [vmem:[#allocation10] sm:$0xff] %v1583_v33  }
 0x3a4   :  { %2002 = shalt.err (!%p1999_p2)
}
 0x3a5   :  { %s2003_s1 = scalar_lea.hbm %s2182_s7, 128 }
 0x3a6   :  { %p2004_p3 = scmp.ne.s32.totalorder %s2182_s7, %s2003_s1  ;;  %p2007_p4 = scmp.lt.u32.totalorder %s2003_s1, %s2182_s7 }
 0x3a8   :  { %p2009_p5 = pnand %p2007_p4, %p2004_p3 }
 0x3aa   :  { %2012 = shalt.err (!%p2009_p5)
}
 0x3ab   :  { %1389 = dma.vmem_to_hbm [thread:$0]  %s1384_s27, 128, %s2182_s7, [#allocation4], %s2028_s28, %s2028_s28, %s2031_s20  }
 0x3ac   :  { %2019 = dma.done.wait [#allocation4], 128  }
 0x3ad   :  { %2020 = vsyncadd [#allocation4], 4294967168 }
 0x3ae   :  { %2021 = dma.done.wait [#allocation12], 128  }
 0x3af   :  { %2022 = vsyncadd [#allocation12], 4294967168 }
 0x3b0   :  { %1408 = vsyncpa [#allocation3], 1 }
 0x3b1   :  { %1409 = vsyncpa [#allocation6], 1 }
 0x3b2   :  { %1410 = vsyncpa [#allocation9], 1 }
 0x3b3   :  { %1411 = vsyncpa [#allocation4], 1 }
 0x3b4   :  { %1412 = vsyncpa [#allocation12], 1 }

</bundles_post_ra>
